<compile_context>
chip_gen: v6e
topology: v6e:2x2x1
jax: 0.10.0
libtpu: 0.0.40
codegen_flags: <defaults>
</compile_context>

<pallas_src>
import math

import jax
import jax.numpy as jnp
import numpy as np
from jax.experimental import pallas as pl
from jax.experimental.pallas import tpu as pltpu


def _to_rgb_kernel(w_mod_ref, bias_ref, x_ref, o_ref):
    # w_mod_ref: (1, O, C)   per-batch modulated 1x1 conv weight (f32)
    # bias_ref:  (O, 1)      conv bias (f32)
    # x_ref:     (1, C, HWt) input spatial tile (all channels of one batch)
    # o_ref:     (1, O, HWt) output spatial tile
    x = x_ref[0]
    # Matmul in x's native dtype; cast only the tiny (O, C) weight. For f32
    # inputs this cast is a no-op (keeps the original full-precision path).
    w = w_mod_ref[0].astype(x.dtype)
    out = jnp.dot(w, x, preferred_element_type=jnp.float32)          # (O, HWt)
    o_ref[0] = (out + bias_ref[...].astype(jnp.float32)).astype(o_ref.dtype)


def _round_up(v, m):
    return (v + m - 1) // m * m


def _sublane_rows(dtype):
    # Rows per vreg sublane tile: 8 for 32-bit, 16 for bf16, 32 for 8-bit.
    return 8 * max(1, 4 // jnp.dtype(dtype).itemsize)


def _pick_hw_tile(hw, c, o, x_dtype, out_dtype, batch,
                  vmem_budget_bytes=12 << 20):
    """Multiple-of-128 spatial tile whose *padded, double-buffered* x+out
    footprint stays under the budget (fits v5e's 16 MiB default scoped VMEM)."""
    if hw <= 128:
        return hw  # full-dim block (allowed even when not a multiple of 128)

    x_item = jnp.dtype(x_dtype).itemsize
    o_item = jnp.dtype(out_dtype).itemsize
    c_pad = _round_up(c, _sublane_rows(x_dtype))
    o_pad = _round_up(o, _sublane_rows(out_dtype))
    # Bytes per spatial element, double-buffered input + output tiles.
    per_lane = 2 * (c_pad * x_item + o_pad * o_item)
    cap = max(128, (vmem_budget_bytes // per_lane) // 128 * 128)

    tile = min(cap, (hw // 128) * 128)

    # Keep both v7x TensorCores busy: ensure >= 2 total grid steps if we can.
    while batch * pl.cdiv(hw, tile) < 2 and tile > 128:
        tile = max(128, (tile // 2) // 128 * 128)
    return tile


def to_rgb(x, style, w_affine, b_affine, w_conv, conv_bias):
    """ToRGB forward.

    x:         (B, C, H, W)
    style:     (B, style_dim)
    w_affine:  (C, style_dim)   nn.Linear(style_dim, C).weight
    b_affine:  (C,)             nn.Linear(style_dim, C).bias
    w_conv:    (O, C)           ModulatedConv2d.weight[0, :, :, 0, 0]
    conv_bias: (O,)             ModulatedConv2d.bias.reshape(O)
    """
    B, C, H, W = x.shape
    S = style.shape[-1]
    O = w_conv.shape[0]
    HW = H * W

    # ELR scale (1/sqrt(style_dim)) and conv scale (1/sqrt(O*C*k*k), k=1).
    elr_scale = 1.0 / math.sqrt(S)
    conv_scale = 1.0 / math.sqrt(O * C)

    # Hoisted style modulation: tiny (B, O, C) weight computed in f32 by XLA.
    s = (style.astype(jnp.float32) * elr_scale) @ jnp.transpose(
        w_affine.astype(jnp.float32))
    s = s + b_affine.astype(jnp.float32) + 1.0                       # (B, C)
    w_mod = (w_conv.astype(jnp.float32)[None, :, :]
             * s[:, None, :] * conv_scale)                           # (B, O, C)
    bias2 = conv_bias.astype(jnp.float32).reshape(O, 1)

    # Lane-dense layout: collapse spatial dims so stores are full-width vst.
    x2 = x.reshape(B, C, HW)
    out_dtype = x.dtype

    hw_tile = _pick_hw_tile(HW, C, O, x.dtype, out_dtype, B)
    n_hw = pl.cdiv(HW, hw_tile)

    cost = pl.CostEstimate(
        flops=2 * B * O * C * HW,
        transcendentals=0,
        bytes_accessed=(B * C * HW * jnp.dtype(x.dtype).itemsize
                        + B * O * HW * jnp.dtype(out_dtype).itemsize
                        + B * O * C * 4 + O * 4),
    )

    out = pl.pallas_call(
        _to_rgb_kernel,
        out_shape=jax.ShapeDtypeStruct((B, O, HW), out_dtype),
        grid_spec=pltpu.PrefetchScalarGridSpec(
            num_scalar_prefetch=0,
            grid=(B, n_hw),
            in_specs=[
                pl.BlockSpec((1, O, C), lambda b, j: (b, 0, 0)),         # w_mod
                pl.BlockSpec((O, 1), lambda b, j: (0, 0)),               # bias
                pl.BlockSpec((1, C, hw_tile), lambda b, j: (b, 0, j)),   # x
            ],
            out_specs=pl.BlockSpec((1, O, hw_tile), lambda b, j: (b, 0, j)),
        ),
        compiler_params=pltpu.CompilerParams(
            dimension_semantics=("parallel", "parallel"),
        ),
        cost_estimate=cost,
    )(w_mod, bias2, x2)

    return out.reshape(B, O, H, W)


if __name__ == "__main__":
    key = jax.random.PRNGKey(0)
    kx, ks, kwa, kba, kwc, kb = jax.random.split(key, 6)

    B, C, H, W = 2, 4, 16, 16
    S = 32   # style_dim
    O = 3    # out_channels (RGB)

    x = jax.random.normal(kx, (B, C, H, W), dtype=jnp.float32)
    style = jax.random.normal(ks, (B, S), dtype=jnp.float32)
    w_affine = jax.random.normal(kwa, (C, S), dtype=jnp.float32)
    b_affine = jax.random.normal(kba, (C,), dtype=jnp.float32)
    w_conv = jax.random.normal(kwc, (O, C), dtype=jnp.float32)
    # torch zero-inits the conv bias; use nonzero values to exercise the add.
    conv_bias = jax.random.normal(kb, (O,), dtype=jnp.float32)

    out = jax.block_until_ready(
        to_rgb(x, style, w_affine, b_affine, w_conv, conv_bias))

    # float64 reference of the ToRGB forward pass.
    xn = np.asarray(x, dtype=np.float64)
    sn = np.asarray(style, dtype=np.float64)
    wan = np.asarray(w_affine, dtype=np.float64)
    ban = np.asarray(b_affine, dtype=np.float64)
    wcn = np.asarray(w_conv, dtype=np.float64)
    bn = np.asarray(conv_bias, dtype=np.float64)

    s_ref = (sn / math.sqrt(S)) @ wan.T + ban + 1.0                  # (B, C)
    w_ref = wcn[None] * s_ref[:, None, :] / math.sqrt(O * C)         # (B, O, C)
    ref = np.einsum("boc,bchw->bohw", w_ref, xn) + bn.reshape(1, O, 1, 1)

    assert out.shape == (B, O, H, W)
    np.testing.assert_allclose(np.asarray(out, dtype=np.float64), ref,
                               atol=2e-2, rtol=2e-2)

    # Exercise the bf16 (no-upcast) path as well, with a looser tolerance.
    out_bf16 = jax.block_until_ready(
        to_rgb(x.astype(jnp.bfloat16), style, w_affine, b_affine, w_conv,
               conv_bias))
    assert out_bf16.shape == (B, O, H, W)
    np.testing.assert_allclose(np.asarray(out_bf16, dtype=np.float64), ref,
                               atol=1e-1, rtol=1e-1)

    print("KERNEL_OK")
</pallas_src>

<mosaic_0001>
module attributes {stable_mosaic.version = 11 : i64} {
  func.func @_to_rgb_kernel(%arg0: i32, %arg1: i32, %arg2: memref<1x3x4xf32, #tpu.memory_space<vmem>>, %arg3: memref<3x1xf32, #tpu.memory_space<vmem>>, %arg4: memref<1x4x256xf32, #tpu.memory_space<vmem>>, %arg5: memref<1x3x256xf32, #tpu.memory_space<vmem>>) attributes {dimension_semantics = [#tpu.dimension_semantics<parallel>, #tpu.dimension_semantics<parallel>], iteration_bounds = array<i64: 2, 1>, scalar_prefetch = 0 : i64, scratch_operands = 0 : i64, tpu.core_type = #tpu.core_type<tc>, window_params = [{transform_indices = @transform_0, window_bounds = array<i64: 1, 3, 4>}, {pipeline_mode = #tpu.pipeline_mode<synchronous>, transform_indices = @transform_1, window_bounds = array<i64: 3, 1>}, {transform_indices = @transform_2, window_bounds = array<i64: 1, 4, 256>}, {transform_indices = @transform_3, window_bounds = array<i64: 1, 3, 256>}]} {
    %c0 = arith.constant 0 : index
    %c0_0 = arith.constant 0 : index
    %c0_1 = arith.constant 0 : index
    %0 = vector.load %arg4[%c0, %c0_0, %c0_1] : memref<1x4x256xf32, #tpu.memory_space<vmem>>, vector<1x4x256xf32>
    %1 = vector.shape_cast %0 : vector<1x4x256xf32> to vector<4x256xf32>
    %c0_2 = arith.constant 0 : index
    %c0_3 = arith.constant 0 : index
    %c0_4 = arith.constant 0 : index
    %2 = vector.load %arg2[%c0_2, %c0_3, %c0_4] : memref<1x3x4xf32, #tpu.memory_space<vmem>>, vector<1x3x4xf32>
    %3 = vector.shape_cast %2 : vector<1x3x4xf32> to vector<3x4xf32>
    %cst = arith.constant dense<0.000000e+00> : vector<3x256xf32>
    %4 = tpu.matmul %3, %1, %cst {dimension_numbers = #tpu.dot_dimension_numbers<[1], [0], [0], [1], [0, 0, 1, 1], [], []>} : vector<3x4xf32>, vector<4x256xf32>, vector<3x256xf32> -> vector<3x256xf32>
    %c0_5 = arith.constant 0 : index
    %c0_6 = arith.constant 0 : index
    %5 = vector.load %arg3[%c0_5, %c0_6] : memref<3x1xf32, #tpu.memory_space<vmem>>, vector<3x1xf32>
    %6 = vector.broadcast %5 : vector<3x1xf32> to vector<3x256xf32>
    %7 = arith.addf %4, %6 : vector<3x256xf32>
    %c0_7 = arith.constant 0 : index
    %c0_8 = arith.constant 0 : index
    %c0_9 = arith.constant 0 : index
    %8 = vector.load %arg5[%c0_7, %c0_8, %c0_9] : memref<1x3x256xf32, #tpu.memory_space<vmem>>, vector<1x3x256xf32>
    %9 = vector.shape_cast %8 : vector<1x3x256xf32> to vector<3x256xf32>
    %10 = vector.shape_cast %7 : vector<3x256xf32> to vector<1x3x256xf32>
    tpu.vector_store %arg5[%c0_7, %c0_8, %c0_9], %10 {strides = array<i32>} : memref<1x3x256xf32, #tpu.memory_space<vmem>>, vector<1x3x256xf32>,
    return
  }
  func.func @transform_0(%arg0: i32, %arg1: i32) -> (i32, i32, i32) {
    %c0_i32 = arith.constant 0 : i32
    %c0_i32_0 = arith.constant 0 : i32
    %c0_i32_1 = arith.constant 0 : i32
    return %arg0, %c0_i32, %c0_i32_0 : i32, i32, i32
  }
  func.func @transform_1(%arg0: i32, %arg1: i32) -> (i32, i32) {
    %c0_i32 = arith.constant 0 : i32
    %c0_i32_0 = arith.constant 0 : i32
    %c0_i32_1 = arith.constant 0 : i32
    return %c0_i32, %c0_i32_0 : i32, i32
  }
  func.func @transform_2(%arg0: i32, %arg1: i32) -> (i32, i32, i32) {
    %c0_i32 = arith.constant 0 : i32
    %c0_i32_0 = arith.constant 0 : i32
    return %arg0, %c0_i32, %arg1 : i32, i32, i32
  }
  func.func @transform_3(%arg0: i32, %arg1: i32) -> (i32, i32, i32) {
    %c0_i32 = arith.constant 0 : i32
    %c0_i32_0 = arith.constant 0 : i32
    return %arg0, %c0_i32, %arg1 : i32, i32, i32
  }
}

</mosaic_0001>

<bundles_post_ra>
// kernel: tpu_custom_call.1
= control target key start
LH: loop header
LB: loop body
LE: loop exit
PB: predicated region body
PF: predicated region fallthrough
CT: control target
= control target key end

     0   :  { %s512_s12 = smov 0   ;;  %s514_s13 = smov 0   ;;  %s551_s0 = inlined_call_operand.vmem [shape: f32[2,3,4], index: 0, kind: input, shape index: {}]   ;;  %s552_s1 = inlined_call_operand.vmem [shape: f32[3,1], index: 1, kind: input, shape index: {}]   ;;  %s553_s2 = inlined_call_operand.vmem [shape: f32[2,4,256], index: 2, kind: input, shape index: {}]   ;;  %s554_s3 = inlined_call_operand.vmem [shape: f32[2,3,256], index: 3, kind: output, shape index: {}]  }
   0x1   :  { %s516_s14 = smov 0  }
   0x2 LB: > { %s25_s15 = sadd.s32 1, %s484_s13  ;;  %p425_p0 = scmp.ge.s32.totalorder %s488_s14, 1  ;;  %s488_s14 = sphi %s516_s14, %s13_s14   ;;  %s484_s13 = sphi %s514_s13, %s556_s13   ;;  %s480_s12 = sphi %s512_s12, %s555_s12  }
   0x3   : > { %p27_p1 = scmp.ge.s32.totalorder %s25_s15, 2  ;;  %p167_p2 = scmp.lt.s32.totalorder %s488_s14, 3 }
   0x5   : > { %s558_s15 = smov (%p27_p1, %s25_s15), 0  ;;  %p168_p3 = pnand %p425_p0, %p167_p2 }
   0x6   : > { %p203_p4 = scmp.lt.s32.totalorder (!%p168_p3), %s480_s12, 1 }
   0x7   : > { %171 = sbr.rel (%p168_p3) target bundleno = 220 (0xdc), region = 32 }
   0xc   : > { %v490_v0 = vmov 0.0   ;;  %v491_v1 = vmov 0   ;;  %v229_v2 = vld [vmem:[%s552_s1] sm:$0x7]  ;;  %s560_s12 = smov (!%p203_p4, %s480_s12), 1  ;;  %vm241_vm0 = vcmask 1043456  }
   0xd   : > { %310 = vmatprep.mubr.f32.mxu0 %v490_v0  ;;  %464 = vset.pattern.permute.xlu0 %v491_v1  ;;  %s436_s18 = sshll.u32 %s560_s12, 3  ;;  %s426_s19 = sshll.u32 %s560_s12, 2  ;;  %vm237_vm1 = vcmask 31744  }
   0xe   : > { %232 = vperm.xlu0 %464, %v229_v2   ;;  %s215_s22 = scalar_lea.vmem %s553_s2, %s436_s18  ;;  %s206_s25 = scalar_lea.vmem %s551_s0, %s426_s19 }
   0xf   : > { %v227_v3 = vld [vmem:[%s215_s22] sm:$0xff]  ;;  %s225_s28 = scalar_lea.vmem %s554_s3, %s436_s18 }
  0x10   : > { %v236_v4 = vcombine.high %v227_v3, %v227_v3  ;;  %v228_v5 = vld [vmem:[%s206_s25] sm:$0x7] }
  0x12   : > { %431 = vmatprep.subr.msk.mxu0 %vm241_vm0, %v236_v4 }
  0x13   : > { %432 = vmatpush1.msk.msra.mxu0 %vm241_vm0, %v227_v3 }
  0x14   : > { %433 = vmatmul.mubr.msk.f32.vlgmr.msra.gmra.mxu0 %vm237_vm1, %v228_v5 }
  0x89   : > { %v233_v6 = vpop.permute.xlu0 %232 }
  0xd4   : > { %v312_v7 = vpop.f32.mrf.mxu0 }
  0xd5   : > { %v313_v9 = vadd.f32 %v312_v7, %v233_v6 }
  0xd6   : > { %v314_v8 = vpop.f32.mrf.mxu0 }
  0xd7   : > { %v315_v10 = vadd.f32 %v314_v8, %v233_v6 }
  0xd9   : > { %v319_v11 = vcombine.low %v313_v9, %v315_v10 }
  0xdb   : > { %321 = vst [vmem:[%s225_s28] sm:$0x77] %v319_v11 }
  0xdc PF: > { %s13_s14 = sadd.s32 1, %s488_s14   ;;  %s555_s12 = smov %s484_s13 }
  0xdd   : > { %p10_p5 = scmp.ge.s32.totalorder %s13_s14, 4   ;;  %s556_s13 = smov %s558_s15 }
  0xdf   :  { %12 = sbr.rel (!%p10_p5) target bundleno = 2 (0x2), region = 65 }

</bundles_post_ra>
